<compile_context>
chip_gen: v5e
topology: v5e:2x2
jax: 0.10.0
libtpu: 0.0.40
codegen_flags: <defaults>
</compile_context>

<pallas_src>
import jax
import jax.numpy as jnp
from jax import lax
from jax.experimental import pallas as pl
from jax.experimental.pallas import tpu as pltpu

# ---- model hyperparameters (synthetic, small) ----
VOCAB_SIZE = 50
D_MODEL = 32
N_SEGMENTS = 2
MAXLEN = 16


def _embedding_kernel(ids_ref, tok_tab_ref, seg_tab_ref, pos_slab_ref, out_ref):
    # ids_ref:      (1, S, 2) int32  -- [..., 0] = token ids, [..., 1] = segment ids
    # tok_tab_ref:  (V, D)     f32   -- resident across the whole grid
    # seg_tab_ref:  (n_seg, D) f32   -- resident
    # pos_slab_ref: (S, D)     f32   -- pos_table[:S]; resident
    # out_ref:      (1, S, D)  f32
    ids = ids_ref[0]                       # (S, 2)
    tok_ids = ids[:, 0:1]                  # (S, 1)
    seg_ids = ids[:, 1:2]                  # (S, 1)

    S = tok_ids.shape[0]
    V, D = tok_tab_ref.shape
    n_seg = seg_tab_ref.shape[0]

    # --- token embedding: one-hot @ table on the MXU (the only real gather) ---
    iota_v = lax.broadcasted_iota(jnp.int32, (S, V), 1)
    one_hot = (iota_v == tok_ids).astype(jnp.float32)                 # (S, V)
    emb = jnp.dot(one_hot, tok_tab_ref[...],
                  preferred_element_type=jnp.float32)                 # (S, D)

    # --- position embedding: pos ids are arange(S) -> just add the slab ---
    emb = emb + pos_slab_ref[...]                                     # (S, D)

    # --- segment embedding: tiny n_segments -> VPU selects, no MXU pass ---
    seg_emb = jnp.broadcast_to(seg_tab_ref[0:1, :], (S, D))
    for s in range(1, n_seg):              # static python loop, n_seg is tiny (2)
        seg_emb = jnp.where(seg_ids == s, seg_tab_ref[s:s + 1, :], seg_emb)
    emb = emb + seg_emb

    out_ref[0] = emb


def embedding_forward(input_ids, seg_ids, tok_table, seg_table, pos_table):
    """input_ids, seg_ids: [B, S] int. Returns [B, S, D] float32."""
    B, S = input_ids.shape
    V, D = tok_table.shape
    n_seg = seg_table.shape[0]

    # Glue matching torch.arange(seq_len).expand_as(input_ids): the positional
    # contribution for every batch row is simply pos_table[:S].
    pos_slab = pos_table[:S].astype(jnp.float32)                      # (S, D)

    # Pack token + segment ids into a single int32 input -> one DMA, not two.
    ids = jnp.stack([input_ids.astype(jnp.int32),
                     seg_ids.astype(jnp.int32)], axis=-1)             # (B, S, 2)

    out = pl.pallas_call(
        _embedding_kernel,
        out_shape=jax.ShapeDtypeStruct((B, S, D), jnp.float32),
        grid=(B,),
        in_specs=[
            pl.BlockSpec((1, S, 2), lambda b: (b, 0, 0)),    # packed ids (per batch)
            pl.BlockSpec((V, D), lambda b: (0, 0)),          # tok table (resident)
            pl.BlockSpec((n_seg, D), lambda b: (0, 0)),      # seg table (resident)
            pl.BlockSpec((S, D), lambda b: (0, 0)),          # pos_table[:S] (resident)
        ],
        out_specs=pl.BlockSpec((1, S, D), lambda b: (b, 0, 0)),
        compiler_params=pltpu.CompilerParams(
            dimension_semantics=("parallel",)),
    )(ids,
      tok_table.astype(jnp.float32),
      seg_table.astype(jnp.float32),
      pos_slab)

    return out


if __name__ == "__main__":
    key = jax.random.PRNGKey(0)
    k_tok, k_seg, k_pos, k_ids, k_sids = jax.random.split(key, 5)

    # deterministic parameter init (nn.Embedding default: N(0, 1))
    tok_table = jax.random.normal(k_tok, (VOCAB_SIZE, D_MODEL), jnp.float32)
    seg_table = jax.random.normal(k_seg, (N_SEGMENTS, D_MODEL), jnp.float32)
    pos_table = jax.random.normal(k_pos, (MAXLEN, D_MODEL), jnp.float32)

    # small example inputs: batch=2, seq=8
    B, S = 2, 8
    input_ids = jax.random.randint(k_ids, (B, S), 0, VOCAB_SIZE, jnp.int32)
    seg_ids = jax.random.randint(k_sids, (B, S), 0, N_SEGMENTS, jnp.int32)

    out = embedding_forward(input_ids, seg_ids, tok_table, seg_table, pos_table)
    out = jax.block_until_ready(out)

    # reference check in plain JAX (same semantics as the torch forward)
    pos_ids = jnp.broadcast_to(jnp.arange(S), (B, S))
    ref = tok_table[input_ids] + pos_table[pos_ids] + seg_table[seg_ids]
    assert out.shape == (B, S, D_MODEL)
    assert jnp.allclose(out, ref, atol=1e-5, rtol=1e-5)

    print("KERNEL_OK")
</pallas_src>

<mosaic_0001>
module attributes {stable_mosaic.version = 11 : i64} {
  func.func @_embedding_kernel(%arg0: i32, %arg1: memref<1x8x2xi32, #tpu.memory_space<vmem>>, %arg2: memref<50x32xf32, #tpu.memory_space<vmem>>, %arg3: memref<2x32xf32, #tpu.memory_space<vmem>>, %arg4: memref<8x32xf32, #tpu.memory_space<vmem>>, %arg5: memref<1x8x32xf32, #tpu.memory_space<vmem>>) attributes {dimension_semantics = [#tpu.dimension_semantics<parallel>], iteration_bounds = array<i64: 2>, scalar_prefetch = 0 : i64, scratch_operands = 0 : i64, tpu.core_type = #tpu.core_type<tc>, window_params = [{transform_indices = @transform_0, window_bounds = array<i64: 1, 8, 2>}, {pipeline_mode = #tpu.pipeline_mode<synchronous>, transform_indices = @transform_1, window_bounds = array<i64: 50, 32>}, {pipeline_mode = #tpu.pipeline_mode<synchronous>, transform_indices = @transform_2, window_bounds = array<i64: 2, 32>}, {pipeline_mode = #tpu.pipeline_mode<synchronous>, transform_indices = @transform_3, window_bounds = array<i64: 8, 32>}, {transform_indices = @transform_4, window_bounds = array<i64: 1, 8, 32>}]} {
    %c0 = arith.constant 0 : index
    %c0_0 = arith.constant 0 : index
    %c0_1 = arith.constant 0 : index
    %0 = vector.load %arg1[%c0, %c0_0, %c0_1] : memref<1x8x2xi32, #tpu.memory_space<vmem>>, vector<1x8x2xi32>
    %1 = vector.shape_cast %0 : vector<1x8x2xi32> to vector<8x2xi32>
    %2 = vector.extract_strided_slice %1 {offsets = [0, 0], sizes = [8, 1], strides = [1, 1]} : vector<8x2xi32> to vector<8x1xi32>
    %3 = vector.extract_strided_slice %1 {offsets = [0, 1], sizes = [8, 1], strides = [1, 1]} : vector<8x2xi32> to vector<8x1xi32>
    %4 = tpu.iota {dimensions = array<i32: 1>} : vector<8x50xi32>
    %5 = vector.broadcast %2 : vector<8x1xi32> to vector<8x50xi32>
    %6 = arith.cmpi eq, %4, %5 : vector<8x50xi32>
    %7 = arith.extui %6 : vector<8x50xi1> to vector<8x50xi32>
    %8 = arith.sitofp %7 : vector<8x50xi32> to vector<8x50xf32>
    %c0_2 = arith.constant 0 : index
    %c0_3 = arith.constant 0 : index
    %9 = vector.load %arg2[%c0_2, %c0_3] : memref<50x32xf32, #tpu.memory_space<vmem>>, vector<50x32xf32>
    %cst = arith.constant dense<0.000000e+00> : vector<8x32xf32>
    %10 = tpu.matmul %8, %9, %cst {dimension_numbers = #tpu.dot_dimension_numbers<[1], [0], [0], [1], [0, 0, 1, 1], [], []>} : vector<8x50xf32>, vector<50x32xf32>, vector<8x32xf32> -> vector<8x32xf32>
    %c0_4 = arith.constant 0 : index
    %c0_5 = arith.constant 0 : index
    %11 = vector.load %arg4[%c0_4, %c0_5] : memref<8x32xf32, #tpu.memory_space<vmem>>, vector<8x32xf32>
    %12 = arith.addf %10, %11 : vector<8x32xf32>
    %c0_6 = arith.constant 0 : index
    %c0_7 = arith.constant 0 : index
    %13 = vector.load %arg3[%c0_6, %c0_7] : memref<2x32xf32, #tpu.memory_space<vmem>>, vector<1x32xf32>
    %14 = vector.shape_cast %13 : vector<1x32xf32> to vector<1x32xf32>
    %15 = vector.broadcast %14 : vector<1x32xf32> to vector<8x32xf32>
    %c1_i32 = arith.constant 1 : i32
    %16 = vector.broadcast %c1_i32 : i32 to vector<8x1xi32>
    %17 = arith.cmpi eq, %3, %16 : vector<8x1xi32>
    %c1 = arith.constant 1 : index
    %c0_8 = arith.constant 0 : index
    %18 = vector.load %arg3[%c1, %c0_8] : memref<2x32xf32, #tpu.memory_space<vmem>>, vector<1x32xf32>
    %19 = vector.shape_cast %17 : vector<8x1xi1> to vector<8x1xi1>
    %20 = vector.broadcast %19 : vector<8x1xi1> to vector<8x32xi1>
    %21 = vector.shape_cast %18 : vector<1x32xf32> to vector<1x32xf32>
    %22 = vector.broadcast %21 : vector<1x32xf32> to vector<8x32xf32>
    %23 = arith.select %20, %22, %15 : vector<8x32xi1>, vector<8x32xf32>
    %24 = arith.addf %12, %23 : vector<8x32xf32>
    %c0_9 = arith.constant 0 : index
    %c0_10 = arith.constant 0 : index
    %c0_11 = arith.constant 0 : index
    %25 = vector.load %arg5[%c0_9, %c0_10, %c0_11] : memref<1x8x32xf32, #tpu.memory_space<vmem>>, vector<1x8x32xf32>
    %26 = vector.shape_cast %25 : vector<1x8x32xf32> to vector<8x32xf32>
    %27 = vector.shape_cast %24 : vector<8x32xf32> to vector<1x8x32xf32>
    tpu.vector_store %arg5[%c0_9, %c0_10, %c0_11], %27 {strides = array<i32>} : memref<1x8x32xf32, #tpu.memory_space<vmem>>, vector<1x8x32xf32>,
    return
  }
  func.func @transform_0(%arg0: i32) -> (i32, i32, i32) {
    %c0_i32 = arith.constant 0 : i32
    %c0_i32_0 = arith.constant 0 : i32
    %c0_i32_1 = arith.constant 0 : i32
    return %arg0, %c0_i32, %c0_i32_0 : i32, i32, i32
  }
  func.func @transform_1(%arg0: i32) -> (i32, i32) {
    %c0_i32 = arith.constant 0 : i32
    %c0_i32_0 = arith.constant 0 : i32
    %c0_i32_1 = arith.constant 0 : i32
    return %c0_i32, %c0_i32_0 : i32, i32
  }
  func.func @transform_2(%arg0: i32) -> (i32, i32) {
    %c0_i32 = arith.constant 0 : i32
    %c0_i32_0 = arith.constant 0 : i32
    %c0_i32_1 = arith.constant 0 : i32
    return %c0_i32, %c0_i32_0 : i32, i32
  }
  func.func @transform_3(%arg0: i32) -> (i32, i32) {
    %c0_i32 = arith.constant 0 : i32
    %c0_i32_0 = arith.constant 0 : i32
    %c0_i32_1 = arith.constant 0 : i32
    return %c0_i32, %c0_i32_0 : i32, i32
  }
  func.func @transform_4(%arg0: i32) -> (i32, i32, i32) {
    %c0_i32 = arith.constant 0 : i32
    %c0_i32_0 = arith.constant 0 : i32
    %c0_i32_1 = arith.constant 0 : i32
    return %arg0, %c0_i32, %c0_i32_0 : i32, i32, i32
  }
}

</mosaic_0001>

<bundles_post_ra>
// kernel: tpu_custom_call.1
= control target key start
LH: loop header
LB: loop body
LE: loop exit
PB: predicated region body
PF: predicated region fallthrough
CT: control target
= control target key end

     0   :  { %9 = vsyncpa [#allocation3], 0  ;;  %s593_s0 = inlined_call_operand.vmem [shape: s32[2,8,2], index: 0, kind: input, shape index: {}]   ;;  %s594_s1 = inlined_call_operand.vmem [shape: f32[50,32], index: 1, kind: input, shape index: {}]   ;;  %s595_s2 = inlined_call_operand.vmem [shape: f32[2,32], index: 2, kind: input, shape index: {}]   ;;  %s596_s3 = inlined_call_operand.vmem [shape: f32[8,32], index: 3, kind: input, shape index: {}]   ;;  %s597_s4 = inlined_call_operand.hbm [shape: f32[2,8,32], index: 4, kind: output, shape index: {}]  }
   0x1   :  { %11 = vsyncpa [#allocation3 + $0x1], 0  ;;  %s478_s15 = smov 0   ;;  %s480_s16 = smov 0  }
   0x2   :  { %s482_s17 = smov 0   ;;  %s484_s18 = smov 0  }
   0x3 LB: > { %s499_s19 = sadd.s32 4294967295, %s448_s18   ;;  %s327_s20 = sadd.s32 4294967294, %s448_s18   ;;  %s448_s18 = sphi %s484_s18, %s603_s18   ;;  %s444_s17 = sphi %s482_s17, %s602_s17   ;;  %s440_s16 = sphi %s480_s16, %s601_s16   ;;  %s436_s15 = sphi %s478_s15, %s600_s15  }
   0x4   : > { %s503_s21 = sadd.s32 1, %s448_s18   ;;  %s113_s22 = sadd.s32 1, %s444_s17 }
   0x5   : > { %s110_s23 = ssub.s32 %s448_s18, %s503_s21  ;;  %p123_p0 = scmp.ne.s32.totalorder %s444_s17, %s440_s16 }
   0x6   : > { %p111_p1 = scmp.eq.s32.totalorder %s110_s23, 0  ;;  %p124_p2 = scmp.eq.s32.totalorder %s499_s19, 1 }
   0x7   : > { %p129_p3 = scmp.ne.s32.totalorder %s440_s16, %s436_s15  ;;  %p130_p4 = scmp.eq.s32.totalorder %s327_s20, 1 }
   0x8   : > { %s514_s24 = scalar_select %p111_p1, %s444_s17, %s113_s22  }
   0x9   : > { %p516_p5 = por %p124_p2, %p123_p0  ;;  %p520_p6 = por %p130_p4, %p129_p3 }
   0xa   : > { %p330_p7 = scmp.ge.s32.totalorder %s448_s18, 1  ;;  %p164_p8 = scmp.lt.s32.totalorder %s448_s18, 3 }
   0xc   : > { %p165_p9 = pnand %p330_p7, %p164_p8 }
   0xd   : > { %p189_p10 = scmp.lt.s32.totalorder (!%p165_p9), %s499_s19, 1  ;;  %s186_s29 = sand.u32 (!%p165_p9), 1, %s440_s16  }
   0xe   : > { %168 = sbr.rel (%p165_p9) target bundleno = 274 (0x112), region = 36  ;;  %s331_s30 = sshll.u32 (!%p165_p9), %s186_s29, 3 }
   0xf   : > { %s253_s23 = scalar_lea.sflag (!%p165_p9), [#allocation3], %s186_s29 }
  0x13   : > { %v208_v0 = vld [vmem:[%s594_s1 + $0x30] sm:$0x3]  ;;  %vm214_vm0 = vcmask 1041408   ;;  %v207_v1 = vld [vmem:[%s594_s1 + $0x28] sm:$0xff]  ;;  %v450_v2 = vmov 0   ;;  %s190_s5 = scalar_select %p189_p10, %s499_s19, 1  ;;  %v194_v11 = vlaneseq }
  0x14   : > { %382 = vset.pattern.permute.xlu0 %v450_v2  ;;  %334 = vmatpush.msk.msra.mxu0 %vm214_vm0, %v208_v0  ;;  %v206_v3 = vld [vmem:[%s594_s1 + $0x20] sm:$0xff]  ;;  %v205_v4 = vld [vmem:[%s594_s1 + $0x18] sm:$0xff]  ;;  %v204_v6 = vld [vmem:[%s594_s1 + $0x10] sm:$0xff]  ;;  %v451_v10 = vmov 1   ;;  %vm210_vm2 = vcmask 408576   ;;  %v452_v14 = vmov 0.0  }
  0x15   : > { %s332_s8 = sshll.u32 %s190_s5, 3  ;;  %v203_v7 = vld [vmem:[%s594_s1 + $0x8] sm:$0xff]  ;;  %v202_v8 = vld [vmem:[%s594_s1] sm:$0xff]  ;;  %v195_v12 = vand.u32 127, %v194_v11  ;;  %s337_s5 = sshll.u32 %s499_s19, 3  ;;  %vm250_vm5 = vcmask 261120  }
  0x16   : > { %228 = vmatpush.msra.mxu0 %v207_v1  ;;  %s192_s13 = scalar_lea.vmem %s593_s0, %s332_s8  ;;  %v384_v17 = vld [vmem:[%s595_s2] ss:$0 sm:$0xff]  ;;  %v385_v18 = vld [vmem:[%s595_s2 + $0x1] ss:$0 sm:$0xff]  ;;  %s263_s12 = scalar_lea.hbm %s597_s4, %s337_s5 }
  0x17   : > { %v193_v5 = vld [vmem:[%s192_s13] sm:$0xff]  ;;  %s188_s19 = scalar_lea.vmem [#allocation2], %s331_s30  ;;  %s267_s22 = sshll.u32 %s263_s12, 4  ;;  %s268_s22 = int_to_ptr.hbm [resolvable:$true] %s267_s22 }
  0x18   : > { %229 = vmatpush.msra.mxu0 %v206_v3  ;;  %197 = vperm.xlu0 %382, %v193_v5   ;;  %vm240_vm1 = vcmp.eq.s32.totalorder %v193_v5, 1  ;;  %v209_v19 = vld [vmem:[%s596_s3] sm:$0xff]  ;;  %s265_s20 = sshll.u32 %s188_s19, 4  ;;  %s400_s27 = sshra.s32 %s268_s22, 4  ;;  %s266_s20 = int_to_ptr.vmem [resolvable:$true] %s265_s20  ;;  %s401_s27 = int_to_ptr.hbm [resolvable:$true] %s400_s27 }
  0x19   : > { %v242_v9 = vsel %vm240_vm1, 1, %v450_v2  ;;  %s402_s28 = scalar_lea.hbm %s401_s27, 8  ;;  %s406_s30 = scalar_lea.hbm %s597_s4, 16 }
  0x1a   : > { %230 = vmatpush.msra.mxu0 %v205_v4  ;;  %p403_p11 = scmp.ne.s32.totalorder %s401_s27, %s402_s28  ;;  %p407_p0 = scmp.lt.s32.totalorder %s401_s27, %s597_s4 }
  0x1b   : > { %p408_p1 = scmp.lt.s32.totalorder %s406_s30, %s402_s28 }
  0x1c   : > { %231 = vmatpush.msra.mxu0 %v204_v6  ;;  %p404_p12 = pnand %p403_p11, %p516_p5 }
  0x1d   : > { %p409_p2 = por %p408_p1, %p407_p0 }
  0x1e   : > { %232 = vmatpush.msra.mxu0 %v203_v7  ;;  %p405_p13 = pneg %p404_p12 }
  0x20   : > { %233 = vmatpush.msra.mxu0 %v202_v8  ;;  %383 = vset.pattern.permute.xlu0 %v451_v10  ;;  %p410_p3 = pnand %p409_p2, %p405_p13 }
  0x21   : > { %244 = vperm.xlu0 %383, %v242_v9  }
  0x8a   : > { %v198_v13 = vpop.permute.xlu0 %197 }
  0x8b   : > { %vm199_vm3 = vcmp.eq.s32.totalorder %v195_v12, %v198_v13 }
  0x8c   : > { %v333_v15 = vsel %vm199_vm3, 1.0, %v452_v14 }
  0x8d   : > { %335 = vmatmul.msk.f32.vlgmr.msra.gmra.mxu0 %vm210_vm2, %v333_v15 }
  0x93   : > { %v245_v16 = vpop.permute.xlu0 %244 }
  0x94   : > { %vm246_vm4 = vcmp.eq.s32.totalorder %v245_v16, 1 }
  0x95   : > { %v248_v21 = vsel %vm246_vm4, %v385_v18, %v384_v17 }
 0x10a   : > { %v235_v20 = vpop.f32.mrf.mxu0 }
 0x10b   : > { %v236_v22 = vadd.f32 %v235_v20, %v209_v19 }
 0x10d   : > { %v249_v23 = vadd.f32 %v248_v21, %v236_v22 }
 0x10f   : > { %251 = vst.msk [vmem:[%s188_s19] sm:$0xff] %vm250_vm5, %v249_v23 }
 0x110   : > { %413 = shalt.err (!%p410_p3)
}
 0x111   : > { %340 = dma.vmem_to_hbm [thread:$0]  (%p516_p5), %s266_s20, 128, %s268_s22, %s253_s23  }
 0x112 PF: > { %p346_p4 = scmp.ge.s32.totalorder %s448_s18, 2  ;;  %s279_s29 = sand.u32 1, %s436_s15  }
 0x113   : > { %s280_s9 = scalar_lea.sflag [#allocation3], %s279_s29 }
 0x114   : > { %p343_p7 = pnand %p346_p4, %p520_p6 }
 0x116   : > { %p344_p8 = pneg %p343_p7 }
 0x118   : > { %431 = dma.done.wait (%p344_p8), %s280_s9, 128  }
 0x119   : > { %433 = vsyncadd (%p344_p8), %s280_s9, 4294967168  ;;  %p14_p9 = scmp.ge.s32.totalorder %s503_s21, 4   ;;  %s600_s15 = smov %s440_s16 }
 0x11a   : > { %s601_s16 = smov %s444_s17  ;;  %s602_s17 = smov %s514_s24 }
 0x11b   : > { %s603_s18 = smov %s503_s21  ;;  %16 = sbr.rel (!%p14_p9) target bundleno = 3 (0x3), region = 71 }
 0x120   :  { %286 = vsyncpa [#allocation3], 1 }
 0x121   :  { %288 = vsyncpa [#allocation3 + $0x1], 1 }

</bundles_post_ra>
